<compile_context>
chip_gen: v6e
topology: v6e:2x2x1
jax: 0.10.0
libtpu: 0.0.40
codegen_flags: <defaults>
</compile_context>

<pallas_src>
import functools

import jax
import jax.numpy as jnp
from jax.experimental import pallas as pl
from jax.experimental.pallas import tpu as pltpu

LN_EPS = 1e-5        # PyTorch nn.LayerNorm default


def _value_head_kernel(num_resblocks, hidden_dim,
                       x_ref, w_in_ref, b_in_ref,
                       gamma_ref, beta_ref, w_rb_ref, b_rb_ref,
                       w_out_ref, b_out_ref,
                       o_ref):
    """Fused ValueHead forward for one batch tile.

    Shapes seen by the kernel (all resident in VMEM):
      x_ref     : [TILE_B, E]  f32
      w_in_ref  : [E, H]       bf16       b_in_ref : [1, H]  f32
      gamma_ref : [2R, H] f32             beta_ref : [2R, H] f32
      w_rb_ref  : [2R, H, H]   bf16       b_rb_ref : [2R, H] f32
      w_out_ref : [1, H]  f32             b_out_ref: [1, 1]  f32
      o_ref     : [TILE_B, 1]  f32
    """
    inv_h = 1.0 / float(hidden_dim)

    # lin_in: bf16 MXU operands, f32 accumulation.
    x16 = x_ref[...].astype(jnp.bfloat16)
    h = jnp.dot(x16, w_in_ref[...],
                preferred_element_type=jnp.float32) + b_in_ref[...]

    # Resblock stack (num_resblocks is a static Python int -> unrolled; fine for
    # small R. For deep stacks, stream w_rb[i] via an extra grid axis instead.)
    for r in range(num_resblocks):
        residual = h
        for l in range(2):
            i = 2 * r + l
            # LayerNorm: centered two-pass variance (no E[x^2]-mean^2 cancellation).
            mean = jnp.sum(h, axis=-1, keepdims=True) * inv_h
            d = h - mean
            var = jnp.sum(d * d, axis=-1, keepdims=True) * inv_h
            inv_std = jax.lax.rsqrt(var + LN_EPS)
            hn = d * inv_std * gamma_ref[i:i + 1, :] + beta_ref[i:i + 1, :]
            # ReLU
            hn = jnp.maximum(hn, 0.0)
            # Linear(H, H): bf16 MXU operands, f32 accumulation.
            h = (jnp.dot(hn.astype(jnp.bfloat16), w_rb_ref[i],
                         preferred_element_type=jnp.float32)
                 + b_rb_ref[i:i + 1, :])
        h = residual + h          # Resblock residual add
        h = jnp.maximum(h, 0.0)   # F.relu in ValueHead.forward

    # lin_out (H -> 1): VPU multiply + lane reduce in f32 (skip the MXU for N=1).
    out_col = jnp.sum(h * w_out_ref[...], axis=-1, keepdims=True) + b_out_ref[...]
    o_ref[...] = out_col.astype(o_ref.dtype)


def _round_up(a, m):
    return (a + m - 1) // m * m


def _cdiv(a, b):
    return (a + b - 1) // b


def value_head_forward(x, params, num_resblocks, *, tile_b=128):
    """x: [B, E] float32. params: dict of stacked f32 weights. Returns [B, 1] float32."""
    B, E = x.shape
    H = params["w_in"].shape[1]
    R = num_resblocks

    # ---- Batch tiling: minimal padding, balanced tiles.
    #      >=2 tiles when the batch is big enough so both v7x TensorCores get work
    #      (the "parallel" grid axis is a no-op on single-TC v5e/v6e).
    B_pad0 = _round_up(B, 8)
    min_tiles = 2 if B_pad0 >= 16 else 1
    n_tiles = max(min_tiles, _cdiv(B_pad0, tile_b))
    TILE_B = _round_up(_cdiv(B_pad0, n_tiles), 8)
    B_pad = TILE_B * n_tiles
    if B_pad != B:
        x = jnp.pad(x, ((0, B_pad - B), (0, 0)))

    # ---- bf16 MXU operand weights (halves their VMEM / DMA footprint).
    w_in = params["w_in"].astype(jnp.bfloat16)
    w_rb = params["w_rb"].astype(jnp.bfloat16)

    kernel = functools.partial(_value_head_kernel, R, H)

    # ---- Explicit scoped-VMEM budget: single-buffered weights + double-buffered
    #      activation/output tiles + in-kernel working set, with headroom.
    weight_bytes = (w_in.size * 2 + w_rb.size * 2
                    + (params["b_in"].size + params["gamma"].size
                       + params["beta"].size + params["b_rb"].size
                       + params["w_out"].size + params["b_out"].size) * 4)
    act_bytes = 2 * TILE_B * E * 4          # x tile, double-buffered
    out_bytes = 2 * TILE_B * 1 * 4          # output tile, double-buffered
    work_bytes = 6 * TILE_B * H * 4         # h / residual / hn / matmul temps
    vmem_est = int(weight_bytes + act_bytes + out_bytes + work_bytes)
    vmem_limit = int(min(64 << 20, max(2 * vmem_est + (2 << 20), 16 << 20)))

    # ---- Advisory cost hint for XLA scheduling.
    flops = 2 * B_pad * (E * H + 2 * R * H * H + H)
    bytes_accessed = int(x.size) * 4 + int(weight_bytes) + B_pad * 4
    cost = pl.CostEstimate(flops=int(flops),
                           transcendentals=int(B_pad * 2 * R),
                           bytes_accessed=int(bytes_accessed))

    # Weights use constant block indices and are single-buffered (Buffered(1)):
    # they stay VMEM-resident across grid steps with no double-buffer overhead.
    wspec = lambda shape, imap: pl.BlockSpec(shape, imap,
                                             pipeline_mode=pl.Buffered(1))

    grid_spec = pltpu.PrefetchScalarGridSpec(
        num_scalar_prefetch=0,
        grid=(n_tiles,),
        in_specs=[
            # activations: streamed per batch tile (double-buffered by Pallas)
            pl.BlockSpec((TILE_B, E), lambda i: (i, 0)),
            # weights: constant index -> resident; single-buffered
            wspec((E, H), lambda i: (0, 0)),
            wspec((1, H), lambda i: (0, 0)),
            wspec((2 * R, H), lambda i: (0, 0)),
            wspec((2 * R, H), lambda i: (0, 0)),
            wspec((2 * R, H, H), lambda i: (0, 0, 0)),
            wspec((2 * R, H), lambda i: (0, 0)),
            wspec((1, H), lambda i: (0, 0)),
            wspec((1, 1), lambda i: (0, 0)),
        ],
        # Narrow [TILE_B, 1] output: payload-exact HBM writes (no 128x slab
        # amplification). Store volume is tiny, so the masked vst is irrelevant.
        out_specs=pl.BlockSpec((TILE_B, 1), lambda i: (i, 0)),
    )

    out = pl.pallas_call(
        kernel,
        out_shape=jax.ShapeDtypeStruct((B_pad, 1), jnp.float32),
        grid_spec=grid_spec,
        compiler_params=pltpu.CompilerParams(
            dimension_semantics=("parallel",),   # batch tiles are independent
            vmem_limit_bytes=vmem_limit),
        cost_estimate=cost,
    )(x,
      w_in, params["b_in"],
      params["gamma"], params["beta"], w_rb, params["b_rb"],
      params["w_out"], params["b_out"])

    return out[:B, :]


def init_params(key, state_embedding_dim, hidden_dim, num_resblocks):
    """Deterministic synthetic parameters (PyTorch-style uniform(+-1/sqrt(fan_in)))."""
    E, H, R = state_embedding_dim, hidden_dim, num_resblocks
    ks = jax.random.split(key, 6)

    def unif(k, shape, fan_in):
        bound = 1.0 / jnp.sqrt(float(fan_in))
        return jax.random.uniform(k, shape, jnp.float32, -bound, bound)

    params = {
        # lin_in: Linear(E, H) -> stored as [E, H] (x @ W)
        "w_in": unif(ks[0], (E, H), E),
        "b_in": unif(ks[1], (1, H), E),
        # resblocks: 2 sub-layers each, stacked along dim 0 (index = 2*r + l)
        "gamma": jnp.ones((2 * R, H), jnp.float32),
        "beta": jnp.zeros((2 * R, H), jnp.float32),
        "w_rb": unif(ks[2], (2 * R, H, H), H),
        "b_rb": unif(ks[3], (2 * R, H), H),
        # lin_out: Linear(H, 1) -> stored as [1, H] (VPU mul + lane reduce)
        "w_out": unif(ks[4], (1, H), H),
        "b_out": unif(ks[5], (1, 1), H),
    }
    return params


def value_head_reference(x, params, num_resblocks, matmul_dtype=None):
    """Pure-jnp reference. matmul_dtype=jnp.bfloat16 mirrors the kernel's MXU casts."""
    def dot(a, w):
        if matmul_dtype is not None:
            a = a.astype(matmul_dtype)
            w = w.astype(matmul_dtype)
        return jnp.dot(a, w, preferred_element_type=jnp.float32)

    h = dot(x, params["w_in"]) + params["b_in"]
    for r in range(num_resblocks):
        residual = h
        for l in range(2):
            i = 2 * r + l
            mean = jnp.mean(h, axis=-1, keepdims=True)
            var = jnp.mean((h - mean) ** 2, axis=-1, keepdims=True)
            hn = (h - mean) / jnp.sqrt(var + LN_EPS)
            hn = hn * params["gamma"][i] + params["beta"][i]
            hn = jnp.maximum(hn, 0.0)
            h = dot(hn, params["w_rb"][i]) + params["b_rb"][i]
        h = jnp.maximum(residual + h, 0.0)
    return jnp.sum(h * params["w_out"], axis=-1, keepdims=True) + params["b_out"]


if __name__ == "__main__":
    # Small shapes consistent with the module's forward:
    #   state_embedding_dim=32, hidden_dim=32, num_resblocks=2
    E, H, R = 32, 32, 2

    key = jax.random.PRNGKey(0)
    k_p, k_x = jax.random.split(key)
    params = init_params(k_p, E, H, R)

    # B=8   : single grid step, zero padding
    # B=300 : multi-step grid (3 balanced tiles of 104, padded to 312)
    for B in (8, 300):
        x = jax.random.normal(jax.random.fold_in(k_x, B), (B, E), jnp.float32)
        out = jax.block_until_ready(value_head_forward(x, params, num_resblocks=R))
        assert out.shape == (B, 1), out.shape
        assert bool(jnp.all(jnp.isfinite(out)))

        # Tight check vs. a reference that mirrors the kernel's bf16 MXU casts.
        ref_bf16 = value_head_reference(x, params, R, matmul_dtype=jnp.bfloat16)
        assert jnp.allclose(out, ref_bf16, atol=2e-3, rtol=2e-3), (
            B, float(jnp.max(jnp.abs(out - ref_bf16))))

        # Loose sanity check vs. the full-f32 reference (bf16 quantization error).
        ref_f32 = value_head_reference(x, params, R, matmul_dtype=None)
        assert jnp.allclose(out, ref_f32, atol=5e-2, rtol=5e-2), (
            B, float(jnp.max(jnp.abs(out - ref_f32))))

    print("KERNEL_OK")
</pallas_src>

<mosaic_0001>
module attributes {stable_mosaic.version = 11 : i64} {
  func.func @_value_head_kernel(%arg0: i32, %arg1: memref<8x32xf32, #tpu.memory_space<vmem>>, %arg2: memref<32x32xbf16, #tpu.memory_space<vmem>>, %arg3: memref<1x32xf32, #tpu.memory_space<vmem>>, %arg4: memref<4x32xf32, #tpu.memory_space<vmem>>, %arg5: memref<4x32xf32, #tpu.memory_space<vmem>>, %arg6: memref<4x32x32xbf16, #tpu.memory_space<vmem>>, %arg7: memref<4x32xf32, #tpu.memory_space<vmem>>, %arg8: memref<1x32xf32, #tpu.memory_space<vmem>>, %arg9: memref<1x1xf32, #tpu.memory_space<vmem>>, %arg10: memref<8x1xf32, #tpu.memory_space<vmem>>) attributes {dimension_semantics = [#tpu.dimension_semantics<parallel>], iteration_bounds = array<i64: 1>, scalar_prefetch = 0 : i64, scratch_operands = 0 : i64, tpu.core_type = #tpu.core_type<tc>, window_params = [{transform_indices = @transform_0, window_bounds = array<i64: 8, 32>}, {pipeline_mode = #tpu.pipeline_mode<synchronous>, transform_indices = @transform_1, window_bounds = array<i64: 32, 32>}, {pipeline_mode = #tpu.pipeline_mode<synchronous>, transform_indices = @transform_2, window_bounds = array<i64: 1, 32>}, {pipeline_mode = #tpu.pipeline_mode<synchronous>, transform_indices = @transform_3, window_bounds = array<i64: 4, 32>}, {pipeline_mode = #tpu.pipeline_mode<synchronous>, transform_indices = @transform_4, window_bounds = array<i64: 4, 32>}, {pipeline_mode = #tpu.pipeline_mode<synchronous>, transform_indices = @transform_5, window_bounds = array<i64: 4, 32, 32>}, {pipeline_mode = #tpu.pipeline_mode<synchronous>, transform_indices = @transform_6, window_bounds = array<i64: 4, 32>}, {pipeline_mode = #tpu.pipeline_mode<synchronous>, transform_indices = @transform_7, window_bounds = array<i64: 1, 32>}, {pipeline_mode = #tpu.pipeline_mode<synchronous>, transform_indices = @transform_8, window_bounds = array<i64: 1, 1>}, {transform_indices = @transform_9, window_bounds = array<i64: 8, 1>}]} {
    %c0 = arith.constant 0 : index
    %c0_0 = arith.constant 0 : index
    %0 = vector.load %arg1[%c0, %c0_0] : memref<8x32xf32, #tpu.memory_space<vmem>>, vector<8x32xf32>
    %1 = arith.truncf %0 : vector<8x32xf32> to vector<8x32xbf16>
    %c0_1 = arith.constant 0 : index
    %c0_2 = arith.constant 0 : index
    %2 = vector.load %arg2[%c0_1, %c0_2] : memref<32x32xbf16, #tpu.memory_space<vmem>>, vector<32x32xbf16>
    %cst = arith.constant dense<0.000000e+00> : vector<8x32xf32>
    %3 = tpu.matmul %1, %2, %cst {dimension_numbers = #tpu.dot_dimension_numbers<[1], [0], [0], [1], [0, 0, 1, 1], [], []>} : vector<8x32xbf16>, vector<32x32xbf16>, vector<8x32xf32> -> vector<8x32xf32>
    %c0_3 = arith.constant 0 : index
    %c0_4 = arith.constant 0 : index
    %4 = vector.load %arg3[%c0_3, %c0_4] : memref<1x32xf32, #tpu.memory_space<vmem>>, vector<1x32xf32>
    %5 = vector.broadcast %4 : vector<1x32xf32> to vector<8x32xf32>
    %6 = arith.addf %3, %5 : vector<8x32xf32>
    %cst_5 = arith.constant dense<0.000000e+00> : vector<8xf32>
    %7 = vector.multi_reduction <add>, %6, %cst_5 [1] : vector<8x32xf32> to vector<8xf32>
    %8 = vector.shape_cast %7 : vector<8xf32> to vector<8x1xf32>
    %cst_6 = arith.constant 3.125000e-02 : f32
    %9 = vector.broadcast %cst_6 : f32 to vector<8x1xf32>
    %10 = arith.mulf %8, %9 : vector<8x1xf32>
    %11 = vector.broadcast %10 : vector<8x1xf32> to vector<8x32xf32>
    %12 = arith.subf %6, %11 : vector<8x32xf32>
    %13 = arith.mulf %12, %12 : vector<8x32xf32>
    %cst_7 = arith.constant dense<0.000000e+00> : vector<8xf32>
    %14 = vector.multi_reduction <add>, %13, %cst_7 [1] : vector<8x32xf32> to vector<8xf32>
    %15 = vector.shape_cast %14 : vector<8xf32> to vector<8x1xf32>
    %cst_8 = arith.constant 3.125000e-02 : f32
    %16 = vector.broadcast %cst_8 : f32 to vector<8x1xf32>
    %17 = arith.mulf %15, %16 : vector<8x1xf32>
    %cst_9 = arith.constant 9.99999974E-6 : f32
    %18 = vector.broadcast %cst_9 : f32 to vector<8x1xf32>
    %19 = arith.addf %17, %18 : vector<8x1xf32>
    %20 = math.rsqrt %19 : vector<8x1xf32>
    %21 = vector.broadcast %20 : vector<8x1xf32> to vector<8x32xf32>
    %22 = arith.mulf %12, %21 : vector<8x32xf32>
    %c0_10 = arith.constant 0 : index
    %c0_11 = arith.constant 0 : index
    %23 = vector.load %arg4[%c0_10, %c0_11] : memref<4x32xf32, #tpu.memory_space<vmem>>, vector<1x32xf32>
    %24 = vector.broadcast %23 : vector<1x32xf32> to vector<8x32xf32>
    %25 = arith.mulf %22, %24 : vector<8x32xf32>
    %c0_12 = arith.constant 0 : index
    %c0_13 = arith.constant 0 : index
    %26 = vector.load %arg5[%c0_12, %c0_13] : memref<4x32xf32, #tpu.memory_space<vmem>>, vector<1x32xf32>
    %27 = vector.broadcast %26 : vector<1x32xf32> to vector<8x32xf32>
    %28 = arith.addf %25, %27 : vector<8x32xf32>
    %cst_14 = arith.constant 0.000000e+00 : f32
    %29 = vector.broadcast %cst_14 : f32 to vector<8x32xf32>
    %30 = arith.maximumf %28, %29 : vector<8x32xf32>
    %31 = arith.truncf %30 : vector<8x32xf32> to vector<8x32xbf16>
    %c0_15 = arith.constant 0 : index
    %c0_16 = arith.constant 0 : index
    %c0_17 = arith.constant 0 : index
    %32 = vector.load %arg6[%c0_15, %c0_16, %c0_17] : memref<4x32x32xbf16, #tpu.memory_space<vmem>>, vector<1x32x32xbf16>
    %33 = vector.shape_cast %32 : vector<1x32x32xbf16> to vector<32x32xbf16>
    %cst_18 = arith.constant dense<0.000000e+00> : vector<8x32xf32>
    %34 = tpu.matmul %31, %33, %cst_18 {dimension_numbers = #tpu.dot_dimension_numbers<[1], [0], [0], [1], [0, 0, 1, 1], [], []>} : vector<8x32xbf16>, vector<32x32xbf16>, vector<8x32xf32> -> vector<8x32xf32>
    %c0_19 = arith.constant 0 : index
    %c0_20 = arith.constant 0 : index
    %35 = vector.load %arg7[%c0_19, %c0_20] : memref<4x32xf32, #tpu.memory_space<vmem>>, vector<1x32xf32>
    %36 = vector.broadcast %35 : vector<1x32xf32> to vector<8x32xf32>
    %37 = arith.addf %34, %36 : vector<8x32xf32>
    %cst_21 = arith.constant dense<0.000000e+00> : vector<8xf32>
    %38 = vector.multi_reduction <add>, %37, %cst_21 [1] : vector<8x32xf32> to vector<8xf32>
    %39 = vector.shape_cast %38 : vector<8xf32> to vector<8x1xf32>
    %cst_22 = arith.constant 3.125000e-02 : f32
    %40 = vector.broadcast %cst_22 : f32 to vector<8x1xf32>
    %41 = arith.mulf %39, %40 : vector<8x1xf32>
    %42 = vector.broadcast %41 : vector<8x1xf32> to vector<8x32xf32>
    %43 = arith.subf %37, %42 : vector<8x32xf32>
    %44 = arith.mulf %43, %43 : vector<8x32xf32>
    %cst_23 = arith.constant dense<0.000000e+00> : vector<8xf32>
    %45 = vector.multi_reduction <add>, %44, %cst_23 [1] : vector<8x32xf32> to vector<8xf32>
    %46 = vector.shape_cast %45 : vector<8xf32> to vector<8x1xf32>
    %cst_24 = arith.constant 3.125000e-02 : f32
    %47 = vector.broadcast %cst_24 : f32 to vector<8x1xf32>
    %48 = arith.mulf %46, %47 : vector<8x1xf32>
    %cst_25 = arith.constant 9.99999974E-6 : f32
    %49 = vector.broadcast %cst_25 : f32 to vector<8x1xf32>
    %50 = arith.addf %48, %49 : vector<8x1xf32>
    %51 = math.rsqrt %50 : vector<8x1xf32>
    %52 = vector.broadcast %51 : vector<8x1xf32> to vector<8x32xf32>
    %53 = arith.mulf %43, %52 : vector<8x32xf32>
    %c1 = arith.constant 1 : index
    %c0_26 = arith.constant 0 : index
    %54 = vector.load %arg4[%c1, %c0_26] : memref<4x32xf32, #tpu.memory_space<vmem>>, vector<1x32xf32>
    %55 = vector.broadcast %54 : vector<1x32xf32> to vector<8x32xf32>
    %56 = arith.mulf %53, %55 : vector<8x32xf32>
    %c1_27 = arith.constant 1 : index
    %c0_28 = arith.constant 0 : index
    %57 = vector.load %arg5[%c1_27, %c0_28] : memref<4x32xf32, #tpu.memory_space<vmem>>, vector<1x32xf32>
    %58 = vector.broadcast %57 : vector<1x32xf32> to vector<8x32xf32>
    %59 = arith.addf %56, %58 : vector<8x32xf32>
    %cst_29 = arith.constant 0.000000e+00 : f32
    %60 = vector.broadcast %cst_29 : f32 to vector<8x32xf32>
    %61 = arith.maximumf %59, %60 : vector<8x32xf32>
    %62 = arith.truncf %61 : vector<8x32xf32> to vector<8x32xbf16>
    %c1_30 = arith.constant 1 : index
    %c0_31 = arith.constant 0 : index
    %c0_32 = arith.constant 0 : index
    %63 = vector.load %arg6[%c1_30, %c0_31, %c0_32] : memref<4x32x32xbf16, #tpu.memory_space<vmem>>, vector<1x32x32xbf16>
    %64 = vector.shape_cast %63 : vector<1x32x32xbf16> to vector<32x32xbf16>
    %cst_33 = arith.constant dense<0.000000e+00> : vector<8x32xf32>
    %65 = tpu.matmul %62, %64, %cst_33 {dimension_numbers = #tpu.dot_dimension_numbers<[1], [0], [0], [1], [0, 0, 1, 1], [], []>} : vector<8x32xbf16>, vector<32x32xbf16>, vector<8x32xf32> -> vector<8x32xf32>
    %c1_34 = arith.constant 1 : index
    %c0_35 = arith.constant 0 : index
    %66 = vector.load %arg7[%c1_34, %c0_35] : memref<4x32xf32, #tpu.memory_space<vmem>>, vector<1x32xf32>
    %67 = vector.broadcast %66 : vector<1x32xf32> to vector<8x32xf32>
    %68 = arith.addf %65, %67 : vector<8x32xf32>
    %69 = arith.addf %6, %68 : vector<8x32xf32>
    %cst_36 = arith.constant 0.000000e+00 : f32
    %70 = vector.broadcast %cst_36 : f32 to vector<8x32xf32>
    %71 = arith.maximumf %69, %70 : vector<8x32xf32>
    %cst_37 = arith.constant dense<0.000000e+00> : vector<8xf32>
    %72 = vector.multi_reduction <add>, %71, %cst_37 [1] : vector<8x32xf32> to vector<8xf32>
    %73 = vector.shape_cast %72 : vector<8xf32> to vector<8x1xf32>
    %cst_38 = arith.constant 3.125000e-02 : f32
    %74 = vector.broadcast %cst_38 : f32 to vector<8x1xf32>
    %75 = arith.mulf %73, %74 : vector<8x1xf32>
    %76 = vector.broadcast %75 : vector<8x1xf32> to vector<8x32xf32>
    %77 = arith.subf %71, %76 : vector<8x32xf32>
    %78 = arith.mulf %77, %77 : vector<8x32xf32>
    %cst_39 = arith.constant dense<0.000000e+00> : vector<8xf32>
    %79 = vector.multi_reduction <add>, %78, %cst_39 [1] : vector<8x32xf32> to vector<8xf32>
    %80 = vector.shape_cast %79 : vector<8xf32> to vector<8x1xf32>
    %cst_40 = arith.constant 3.125000e-02 : f32
    %81 = vector.broadcast %cst_40 : f32 to vector<8x1xf32>
    %82 = arith.mulf %80, %81 : vector<8x1xf32>
    %cst_41 = arith.constant 9.99999974E-6 : f32
    %83 = vector.broadcast %cst_41 : f32 to vector<8x1xf32>
    %84 = arith.addf %82, %83 : vector<8x1xf32>
    %85 = math.rsqrt %84 : vector<8x1xf32>
    %86 = vector.broadcast %85 : vector<8x1xf32> to vector<8x32xf32>
    %87 = arith.mulf %77, %86 : vector<8x32xf32>
    %c2 = arith.constant 2 : index
    %c0_42 = arith.constant 0 : index
    %88 = vector.load %arg4[%c2, %c0_42] : memref<4x32xf32, #tpu.memory_space<vmem>>, vector<1x32xf32>
    %89 = vector.broadcast %88 : vector<1x32xf32> to vector<8x32xf32>
    %90 = arith.mulf %87, %89 : vector<8x32xf32>
    %c2_43 = arith.constant 2 : index
    %c0_44 = arith.constant 0 : index
    %91 = vector.load %arg5[%c2_43, %c0_44] : memref<4x32xf32, #tpu.memory_space<vmem>>, vector<1x32xf32>
    %92 = vector.broadcast %91 : vector<1x32xf32> to vector<8x32xf32>
    %93 = arith.addf %90, %92 : vector<8x32xf32>
    %cst_45 = arith.constant 0.000000e+00 : f32
    %94 = vector.broadcast %cst_45 : f32 to vector<8x32xf32>
    %95 = arith.maximumf %93, %94 : vector<8x32xf32>
    %96 = arith.truncf %95 : vector<8x32xf32> to vector<8x32xbf16>
    %c2_46 = arith.constant 2 : index
    %c0_47 = arith.constant 0 : index
    %c0_48 = arith.constant 0 : index
    %97 = vector.load %arg6[%c2_46, %c0_47, %c0_48] : memref<4x32x32xbf16, #tpu.memory_space<vmem>>, vector<1x32x32xbf16>
    %98 = vector.shape_cast %97 : vector<1x32x32xbf16> to vector<32x32xbf16>
    %cst_49 = arith.constant dense<0.000000e+00> : vector<8x32xf32>
    %99 = tpu.matmul %96, %98, %cst_49 {dimension_numbers = #tpu.dot_dimension_numbers<[1], [0], [0], [1], [0, 0, 1, 1], [], []>} : vector<8x32xbf16>, vector<32x32xbf16>, vector<8x32xf32> -> vector<8x32xf32>
    %c2_50 = arith.constant 2 : index
    %c0_51 = arith.constant 0 : index
    %100 = vector.load %arg7[%c2_50, %c0_51] : memref<4x32xf32, #tpu.memory_space<vmem>>, vector<1x32xf32>
    %101 = vector.broadcast %100 : vector<1x32xf32> to vector<8x32xf32>
    %102 = arith.addf %99, %101 : vector<8x32xf32>
    %cst_52 = arith.constant dense<0.000000e+00> : vector<8xf32>
    %103 = vector.multi_reduction <add>, %102, %cst_52 [1] : vector<8x32xf32> to vector<8xf32>
    %104 = vector.shape_cast %103 : vector<8xf32> to vector<8x1xf32>
    %cst_53 = arith.constant 3.125000e-02 : f32
    %105 = vector.broadcast %cst_53 : f32 to vector<8x1xf32>
    %106 = arith.mulf %104, %105 : vector<8x1xf32>
    %107 = vector.broadcast %106 : vector<8x1xf32> to vector<8x32xf32>
    %108 = arith.subf %102, %107 : vector<8x32xf32>
    %109 = arith.mulf %108, %108 : vector<8x32xf32>
    %cst_54 = arith.constant dense<0.000000e+00> : vector<8xf32>
    %110 = vector.multi_reduction <add>, %109, %cst_54 [1] : vector<8x32xf32> to vector<8xf32>
    %111 = vector.shape_cast %110 : vector<8xf32> to vector<8x1xf32>
    %cst_55 = arith.constant 3.125000e-02 : f32
    %112 = vector.broadcast %cst_55 : f32 to vector<8x1xf32>
    %113 = arith.mulf %111, %112 : vector<8x1xf32>
    %cst_56 = arith.constant 9.99999974E-6 : f32
    %114 = vector.broadcast %cst_56 : f32 to vector<8x1xf32>
    %115 = arith.addf %113, %114 : vector<8x1xf32>
    %116 = math.rsqrt %115 : vector<8x1xf32>
    %117 = vector.broadcast %116 : vector<8x1xf32> to vector<8x32xf32>
    %118 = arith.mulf %108, %117 : vector<8x32xf32>
    %c3 = arith.constant 3 : index
    %c0_57 = arith.constant 0 : index
    %119 = vector.load %arg4[%c3, %c0_57] : memref<4x32xf32, #tpu.memory_space<vmem>>, vector<1x32xf32>
    %120 = vector.broadcast %119 : vector<1x32xf32> to vector<8x32xf32>
    %121 = arith.mulf %118, %120 : vector<8x32xf32>
    %c3_58 = arith.constant 3 : index
    %c0_59 = arith.constant 0 : index
    %122 = vector.load %arg5[%c3_58, %c0_59] : memref<4x32xf32, #tpu.memory_space<vmem>>, vector<1x32xf32>
    %123 = vector.broadcast %122 : vector<1x32xf32> to vector<8x32xf32>
    %124 = arith.addf %121, %123 : vector<8x32xf32>
    %cst_60 = arith.constant 0.000000e+00 : f32
    %125 = vector.broadcast %cst_60 : f32 to vector<8x32xf32>
    %126 = arith.maximumf %124, %125 : vector<8x32xf32>
    %127 = arith.truncf %126 : vector<8x32xf32> to vector<8x32xbf16>
    %c3_61 = arith.constant 3 : index
    %c0_62 = arith.constant 0 : index
    %c0_63 = arith.constant 0 : index
    %128 = vector.load %arg6[%c3_61, %c0_62, %c0_63] : memref<4x32x32xbf16, #tpu.memory_space<vmem>>, vector<1x32x32xbf16>
    %129 = vector.shape_cast %128 : vector<1x32x32xbf16> to vector<32x32xbf16>
    %cst_64 = arith.constant dense<0.000000e+00> : vector<8x32xf32>
    %130 = tpu.matmul %127, %129, %cst_64 {dimension_numbers = #tpu.dot_dimension_numbers<[1], [0], [0], [1], [0, 0, 1, 1], [], []>} : vector<8x32xbf16>, vector<32x32xbf16>, vector<8x32xf32> -> vector<8x32xf32>
    %c3_65 = arith.constant 3 : index
    %c0_66 = arith.constant 0 : index
    %131 = vector.load %arg7[%c3_65, %c0_66] : memref<4x32xf32, #tpu.memory_space<vmem>>, vector<1x32xf32>
    %132 = vector.broadcast %131 : vector<1x32xf32> to vector<8x32xf32>
    %133 = arith.addf %130, %132 : vector<8x32xf32>
    %134 = arith.addf %71, %133 : vector<8x32xf32>
    %cst_67 = arith.constant 0.000000e+00 : f32
    %135 = vector.broadcast %cst_67 : f32 to vector<8x32xf32>
    %136 = arith.maximumf %134, %135 : vector<8x32xf32>
    %c0_68 = arith.constant 0 : index
    %c0_69 = arith.constant 0 : index
    %137 = vector.load %arg8[%c0_68, %c0_69] : memref<1x32xf32, #tpu.memory_space<vmem>>, vector<1x32xf32>
    %138 = vector.broadcast %137 : vector<1x32xf32> to vector<8x32xf32>
    %139 = arith.mulf %136, %138 : vector<8x32xf32>
    %cst_70 = arith.constant dense<0.000000e+00> : vector<8xf32>
    %140 = vector.multi_reduction <add>, %139, %cst_70 [1] : vector<8x32xf32> to vector<8xf32>
    %141 = vector.shape_cast %140 : vector<8xf32> to vector<8x1xf32>
    %c0_71 = arith.constant 0 : index
    %c0_72 = arith.constant 0 : index
    %142 = vector.load %arg9[%c0_71, %c0_72] : memref<1x1xf32, #tpu.memory_space<vmem>>, vector<1x1xf32>
    %143 = vector.broadcast %142 : vector<1x1xf32> to vector<8x1xf32>
    %144 = arith.addf %141, %143 : vector<8x1xf32>
    %c0_73 = arith.constant 0 : index
    %c0_74 = arith.constant 0 : index
    %145 = vector.load %arg10[%c0_73, %c0_74] : memref<8x1xf32, #tpu.memory_space<vmem>>, vector<8x1xf32>
    tpu.vector_store %arg10[%c0_73, %c0_74], %144 {strides = array<i32>} : memref<8x1xf32, #tpu.memory_space<vmem>>, vector<8x1xf32>,
    return
  }
  func.func @transform_0(%arg0: i32) -> (i32, i32) {
    %c0_i32 = arith.constant 0 : i32
    %c0_i32_0 = arith.constant 0 : i32
    return %arg0, %c0_i32 : i32, i32
  }
  func.func @transform_1(%arg0: i32) -> (i32, i32) {
    %c0_i32 = arith.constant 0 : i32
    %c0_i32_0 = arith.constant 0 : i32
    %c0_i32_1 = arith.constant 0 : i32
    return %c0_i32, %c0_i32_0 : i32, i32
  }
  func.func @transform_2(%arg0: i32) -> (i32, i32) {
    %c0_i32 = arith.constant 0 : i32
    %c0_i32_0 = arith.constant 0 : i32
    %c0_i32_1 = arith.constant 0 : i32
    return %c0_i32, %c0_i32_0 : i32, i32
  }
  func.func @transform_3(%arg0: i32) -> (i32, i32) {
    %c0_i32 = arith.constant 0 : i32
    %c0_i32_0 = arith.constant 0 : i32
    %c0_i32_1 = arith.constant 0 : i32
    return %c0_i32, %c0_i32_0 : i32, i32
  }
  func.func @transform_4(%arg0: i32) -> (i32, i32) {
    %c0_i32 = arith.constant 0 : i32
    %c0_i32_0 = arith.constant 0 : i32
    %c0_i32_1 = arith.constant 0 : i32
    return %c0_i32, %c0_i32_0 : i32, i32
  }
  func.func @transform_5(%arg0: i32) -> (i32, i32, i32) {
    %c0_i32 = arith.constant 0 : i32
    %c0_i32_0 = arith.constant 0 : i32
    %c0_i32_1 = arith.constant 0 : i32
    %c0_i32_2 = arith.constant 0 : i32
    return %c0_i32, %c0_i32_0, %c0_i32_1 : i32, i32, i32
  }
  func.func @transform_6(%arg0: i32) -> (i32, i32) {
    %c0_i32 = arith.constant 0 : i32
    %c0_i32_0 = arith.constant 0 : i32
    %c0_i32_1 = arith.constant 0 : i32
    return %c0_i32, %c0_i32_0 : i32, i32
  }
  func.func @transform_7(%arg0: i32) -> (i32, i32) {
    %c0_i32 = arith.constant 0 : i32
    %c0_i32_0 = arith.constant 0 : i32
    %c0_i32_1 = arith.constant 0 : i32
    return %c0_i32, %c0_i32_0 : i32, i32
  }
  func.func @transform_8(%arg0: i32) -> (i32, i32) {
    %c0_i32 = arith.constant 0 : i32
    %c0_i32_0 = arith.constant 0 : i32
    %c0_i32_1 = arith.constant 0 : i32
    return %c0_i32, %c0_i32_0 : i32, i32
  }
  func.func @transform_9(%arg0: i32) -> (i32, i32) {
    %c0_i32 = arith.constant 0 : i32
    %c0_i32_0 = arith.constant 0 : i32
    return %arg0, %c0_i32 : i32, i32
  }
}

</mosaic_0001>

<bundles_post_ra>
// kernel: tpu_custom_call.1
= control target key start
LH: loop header
LB: loop body
LE: loop exit
PB: predicated region body
PF: predicated region fallthrough
CT: control target
= control target key end

     0   :  { %s916_s0 = inlined_call_operand.hbm [shape: f32[8,32], index: 0, kind: input, shape index: {}]   ;;  %s917_s1 = inlined_call_operand.hbm [shape: bf16[32,32], index: 1, kind: input, shape index: {}]   ;;  %s918_s2 = inlined_call_operand.hbm [shape: f32[1,32], index: 2, kind: input, shape index: {}]   ;;  %s919_s3 = inlined_call_operand.vmem [shape: f32[4,32], index: 3, kind: input, shape index: {}]   ;;  %s920_s4 = inlined_call_operand.vmem [shape: f32[4,32], index: 4, kind: input, shape index: {}]   ;;  %s921_s5 = inlined_call_operand.hbm [shape: bf16[4,32,32], index: 5, kind: input, shape index: {}]   ;;  %s922_s6 = inlined_call_operand.vmem [shape: f32[4,32], index: 6, kind: input, shape index: {}]   ;;  %s923_s7 = inlined_call_operand.vmem [shape: f32[1,32], index: 7, kind: input, shape index: {}]   ;;  %s924_s8 = inlined_call_operand.<no memory space> [shape: f32[1,1], index: 8, kind: input, shape index: {}]   ;;  %s925_s9 = inlined_call_operand.vmem [shape: f32[8,1], index: 9, kind: output, shape index: {}]  }
   0x1   :  { %v14_v0 = vstv %s924_s8 }
   0x2   :  { %15 = vst [vmem:[#allocation2] sm:$0x1] %v14_v0 }
   0x3   :  { %16 = vsyncpa [#allocation4], 0 }
   0x4   :  { %17 = vsyncpa [#allocation6], 0 }
   0x5   :  { %18 = vsyncpa [#allocation9], 0  ;;  %s751_s11 = smov [#allocation5]  }
   0x6   :  { %s34_s12 = sshll.u32 %s751_s11, 4  ;;  %s35_s12 = int_to_ptr.vmem [resolvable:$true] %s34_s12 }
   0x7   :  { %s673_s13 = scalar_lea.vmem %s35_s12, 256  ;;  %p678_p1 = scmp.lt.s32.totalorder %s35_s12, %s35_s12 }
   0x8   :  { %p674_p0 = scmp.ne.s32.totalorder %s35_s12, %s673_s13  ;;  %p679_p2 = scmp.lt.s32.totalorder %s673_s13, %s673_s13 }
   0xa   :  { %p680_p3 = por %p679_p2, %p678_p1 }
   0xc   :  { %p681_p4 = pnand %p680_p3, %p674_p0 }
   0xe   :  { %684 = shalt.err (!%p681_p4)
}
   0xf   :  { %s752_s14 = smov 64   ;;  %s753_s15 = smov 4  }
  0x10   :  { %40 = dma.hbm_to_vmem [thread:$0]  %s917_s1, 256, %s35_s12, [#allocation6], %s752_s14, %s752_s14, %s753_s15  }
  0x11   :  { %s754_s17 = smov [#allocation3]   ;;  %s755_s19 = smov [#allocation7]  }
  0x12   :  { %s25_s18 = sshll.u32 %s754_s17, 4  ;;  %s47_s20 = sshll.u32 %s755_s19, 4  ;;  %s26_s18 = int_to_ptr.vmem [resolvable:$true] %s25_s18  ;;  %s48_s20 = int_to_ptr.vmem [resolvable:$true] %s47_s20 }
  0x13   :  { %s693_s21 = scalar_lea.vmem %s26_s18, 128  ;;  %p698_p6 = scmp.lt.s32.totalorder %s26_s18, %s26_s18 }
  0x14   :  { %p694_p5 = scmp.ne.s32.totalorder %s26_s18, %s693_s21  ;;  %p699_p7 = scmp.lt.s32.totalorder %s693_s21, %s693_s21 }
  0x16   :  { %p700_p8 = por %p699_p7, %p698_p6 }
  0x18   :  { %p701_p9 = pnand %p700_p8, %p694_p5 }
  0x1a   :  { %704 = shalt.err (!%p701_p9)
}
  0x1b   :  { %28 = dma.hbm_to_vmem [thread:$0]  %s916_s0, 128, %s26_s18, [#allocation4]  }
  0x1c   :  { %s713_s24 = scalar_lea.vmem %s48_s20, 16  ;;  %s717_s1 = scalar_lea.vmem %s48_s20, 32 }
  0x1d   :  { %p714_p10 = scmp.ne.s32.totalorder %s48_s20, %s713_s24  ;;  %p718_p11 = scmp.lt.s32.totalorder %s48_s20, %s48_s20 }
  0x1e   :  { %p719_p12 = scmp.lt.s32.totalorder %s717_s1, %s713_s24 }
  0x20   :  { %p720_p13 = por %p719_p12, %p718_p11 }
  0x22   :  { %p721_p0 = pnand %p720_p13, %p714_p10 }
  0x24   :  { %724 = shalt.err (!%p721_p0)
}
  0x25   :  { %50 = dma.hbm_to_vmem [thread:$0]  %s918_s2, 16, %s48_s20, [#allocation6]  }
  0x26   :  { %s756_s27 = smov [#allocation8]  }
  0x27   :  { %s60_s28 = sshll.u32 %s756_s27, 4  ;;  %s61_s28 = int_to_ptr.vmem [resolvable:$true] %s60_s28 }
  0x28   :  { %s733_s29 = scalar_lea.vmem %s61_s28, 1024  ;;  %p738_p2 = scmp.lt.s32.totalorder %s61_s28, %s61_s28 }
  0x29   :  { %p734_p1 = scmp.ne.s32.totalorder %s61_s28, %s733_s29  ;;  %p739_p3 = scmp.lt.s32.totalorder %s733_s29, %s733_s29 }
  0x2b   :  { %p740_p4 = por %p739_p3, %p738_p2 }
  0x2d   :  { %p741_p5 = pnand %p740_p4, %p734_p1 }
  0x2f   :  { %744 = shalt.err (!%p741_p5)
}
  0x30   :  { %66 = dma.hbm_to_vmem [thread:$0]  %s921_s5, 1024, %s61_s28, [#allocation9], %s752_s14, %s752_s14, %s753_s15  }
  0x31   :  { %745 = dma.done.wait [#allocation4], 128  }
  0x32   :  { %746 = vsyncadd [#allocation4], 4294967168 }
  0x33   :  { %747 = dma.done.wait [#allocation6], 272  }
  0x34   :  { %748 = vsyncadd [#allocation6], 4294967024 }
  0x35   :  { %749 = dma.done.wait [#allocation9], 1024  }
  0x36   :  { %750 = vsyncadd [#allocation9], 4294966272  ;;  %v757_v1 = vmov 0.0   ;;  %vm758_vm0 = vmmov 0   ;;  %v647_v2 = vld [vmem:[#allocation5 + $0x8] sm:$0xff]   ;;  %v648_v3 = vld [vmem:[#allocation5] sm:$0xff]  }
  0x37   :  { %599 = vmatprep.subr.bf16.mxu0 %v757_v1  ;;  %603 = vmatprep.mubr.msk.bf16.mxu0 %vm758_vm0, %v757_v1  ;;  %v86_v4 = vld [vmem:[#allocation3] sm:$0xff]  ;;  %vm111_vm1 = vcmask 261120   ;;  %v554_v6 = vld [vmem:[#allocation7] ss:$0 sm:$0xff]  ;;  %v558_v24 = vld [vmem:[%s919_s3] ss:$0 sm:$0xff] }
  0x38   :  { %607 = vmatprep.subr.bf16.mxu1 %v757_v1  ;;  %611 = vmatprep.mubr.msk.bf16.mxu1 %vm758_vm0, %v757_v1  ;;  %v87_v5 = vpack.c.bf16 %v86_v4, %v86_v4  ;;  %v649_v18 = vld [vmem:[#allocation8 + $0x8] sm:$0xff]   ;;  %v650_v19 = vld [vmem:[#allocation8] sm:$0xff]   ;;  %v651_v43 = vld [vmem:[#allocation8 + $0x18] sm:$0xff]   ;;  %vm545_vm2 = vcmask 7168  }
  0x39   :  { %600 = vmatpush3.bf16.msra.mxu0 %v647_v2  ;;  %608 = vmatpush3.bf16.msra.mxu1 %v649_v18  ;;  %v559_v26 = vld [vmem:[%s920_s4] ss:$0 sm:$0xff]  ;;  %v652_v44 = vld [vmem:[#allocation8 + $0x10] sm:$0xff]   ;;  %v564_v49 = vld [vmem:[%s919_s3 + $0x1] ss:$0 sm:$0xff] }
  0x3a   :  { %601 = vmatprep.subr.bf16.mxu0 %v757_v1  ;;  %609 = vmatprep.subr.bf16.mxu1 %v757_v1  ;;  %v560_v31 = vld [vmem:[%s922_s6] ss:$0 sm:$0xff]  ;;  %v565_v51 = vld [vmem:[%s920_s4 + $0x1] ss:$0 sm:$0xff] }
  0x3b   :  { %v566_v56 = vld [vmem:[%s922_s6 + $0x1] ss:$0 sm:$0xff] }
  0x3d   :  { %602 = vmatpush3.bf16.msra.mxu0 %v648_v3  ;;  %610 = vmatpush3.bf16.msra.mxu1 %v650_v19 }
  0x3e   :  { %615 = vmatprep.subr.bf16.mxu0 %v757_v1  ;;  %623 = vmatprep.subr.bf16.mxu1 %v757_v1 }
  0x40   :  { %604 = vmatmul.mubr.msk.bf16.vlgmr.msra.gmra.mxu0 %vm111_vm1, %v87_v5 }
  0x41   :  { %619 = vmatprep.mubr.msk.bf16.mxu0 %vm758_vm0, %v757_v1  ;;  %616 = vmatpush3.bf16.msra.mxu0 %v651_v43 }
  0x42   :  { %617 = vmatprep.subr.bf16.mxu0 %v757_v1 }
  0x45   :  { %618 = vmatpush3.bf16.msra.mxu0 %v652_v44 }
  0x46   :  { %631 = vmatprep.subr.bf16.mxu0 %v757_v1 }
 0x100   :  { %v149_v7 = vpop.f32.mrf.mxu0 }
 0x101   :  { %v841_v8 = vadd.f32 %v554_v6, %v149_v7  ;;  %v653_v7 = vld [vmem:[#allocation8 + $0x28] sm:$0xff]  }
 0x102   :  { %v605_v9 = vpop.f32.mrf.mxu0 }
 0x103   :  { %v155_v10 = vsel %vm111_vm1, %v841_v8, 0.0  ;;  %v654_v9 = vld [vmem:[#allocation8 + $0x20] sm:$0xff]  }
 0x104   :  { %156 = vadd.xlane.f32.xlu0 %v155_v10  ;;  %v152_v11 = vpop.f32.mrf.mxu0 }
 0x106   :  { %v606_v12 = vpop.f32.mrf.mxu0 }
 0x18d   :  { %v157_v13 = vpop.xlane.xlu0 %156 }
 0x18e   :  { %v158_v14 = vmul.f32 0.03125, %v157_v13  ;;  %v570_v13 = vld [vmem:[%s919_s3 + $0x2] ss:$0 sm:$0xff] }
 0x190   :  { %v159_v15 = vsub.f32 %v841_v8, %v158_v14 }
 0x192   :  { %v160_v16 = vmul.f32 %v159_v15, %v159_v15 }
 0x194   :  { %v161_v17 = vsel %vm111_vm1, %v160_v16, 0.0 }
 0x195   :  { %162 = vadd.xlane.f32.xlu0 %v161_v17 }
 0x21e   :  { %v163_v20 = vpop.xlane.xlu0 %162 }
 0x21f   :  { %v164_v21 = vmul.f32 0.03125, %v163_v20  ;;  %v572_v20 = vld [vmem:[%s922_s6 + $0x2] ss:$0 sm:$0xff] }
 0x221   :  { %v165_v22 = vadd.f32 1e-05, %v164_v21 }
 0x223   :  { %657 = vrsqrt.f32 %v165_v22 }
 0x230   :  { %v658_v23 = vpop.eup %657 }
 0x231   :  { %v167_v25 = vmul.f32 %v658_v23, %v159_v15  ;;  %v571_v15 = vld [vmem:[%s920_s4 + $0x2] ss:$0 sm:$0xff] }
 0x233   :  { %v173_v27 = vmul.f32 %v558_v24, %v167_v25 }
 0x235   :  { %v179_v28 = vadd.f32 %v559_v26, %v173_v27 }
 0x237   :  { %v180_v29 = vmax.f32 %v179_v28, 0.0 }
 0x239   :  { %v181_v30 = vpack.c.bf16 %v180_v29, %v180_v29 }
 0x23b   :  { %612 = vmatmul.mubr.msk.bf16.vlgmr.msra.gmra.mxu1 %vm111_vm1, %v181_v30 }
 0x23c   :  { %627 = vmatprep.mubr.msk.bf16.mxu1 %vm758_vm0, %v757_v1  ;;  %624 = vmatpush3.bf16.msra.mxu1 %v653_v7 }
 0x23d   :  { %625 = vmatprep.subr.bf16.mxu1 %v757_v1 }
 0x240   :  { %626 = vmatpush3.bf16.msra.mxu1 %v654_v9 }
 0x2fb   :  { %v240_v32 = vpop.f32.mrf.mxu1 }
 0x2fc   :  { %v241_v33 = vadd.f32 %v560_v31, %v240_v32  ;;  %v655_v32 = vld [vmem:[#allocation8 + $0x38] sm:$0xff]  }
 0x2fd   :  { %v613_v34 = vpop.f32.mrf.mxu1 }
 0x2fe   :  { %v246_v35 = vsel %vm111_vm1, %v241_v33, 0.0 }
 0x2ff   :  { %247 = vadd.xlane.f32.xlu1 %v246_v35  ;;  %v243_v36 = vpop.f32.mrf.mxu1 }
 0x301   :  { %v614_v37 = vpop.f32.mrf.mxu1 }
 0x388   :  { %v248_v38 = vpop.xlane.xlu1 %247 }
 0x389   :  { %v249_v39 = vmul.f32 0.03125, %v248_v38  ;;  %v576_v38 = vld [vmem:[%s919_s3 + $0x3] ss:$0 sm:$0xff] }
 0x38b   :  { %v250_v40 = vsub.f32 %v241_v33, %v249_v39  ;;  %v656_v33 = vld [vmem:[#allocation8 + $0x30] sm:$0xff]  }
 0x38d   :  { %v251_v41 = vmul.f32 %v250_v40, %v250_v40 }
 0x38f   :  { %v252_v42 = vsel %vm111_vm1, %v251_v41, 0.0 }
 0x390   :  { %253 = vadd.xlane.f32.xlu1 %v252_v42 }
 0x419   :  { %v254_v45 = vpop.xlane.xlu1 %253 }
 0x41a   :  { %v255_v46 = vmul.f32 0.03125, %v254_v45 }
 0x41c   :  { %v256_v47 = vadd.f32 1e-05, %v255_v46 }
 0x41e   :  { %659 = vrsqrt.f32 %v256_v47 }
 0x42b   :  { %v660_v48 = vpop.eup %659 }
 0x42c   :  { %v258_v50 = vmul.f32 %v660_v48, %v250_v40  ;;  %v577_v40 = vld [vmem:[%s920_s4 + $0x3] ss:$0 sm:$0xff] }
 0x42e   :  { %v264_v52 = vmul.f32 %v564_v49, %v258_v50  ;;  %v582_v50 = vld [vmem:[%s923_s7] ss:$0 sm:$0xff] }
 0x430   :  { %v270_v53 = vadd.f32 %v565_v51, %v264_v52 }
 0x432   :  { %v271_v54 = vmax.f32 %v270_v53, 0.0 }
 0x434   :  { %v272_v55 = vpack.c.bf16 %v271_v54, %v271_v54 }
 0x436   :  { %620 = vmatmul.mubr.msk.bf16.vlgmr.msra.gmra.mxu0 %vm111_vm1, %v272_v55  ;;  %v583_v55 = vld [vmem:[#allocation2] ss:$0 sm:$0xff] }
 0x437   :  { %635 = vmatprep.mubr.msk.bf16.mxu0 %vm758_vm0, %v757_v1  ;;  %632 = vmatpush3.bf16.msra.mxu0 %v655_v32 }
 0x438   :  { %633 = vmatprep.subr.bf16.mxu0 %v757_v1  ;;  %v578_v1 = vld [vmem:[%s922_s6 + $0x3] ss:$0 sm:$0xff] }
 0x43b   :  { %634 = vmatpush3.bf16.msra.mxu0 %v656_v33 }
 0x4f6   :  { %v332_v57 = vpop.f32.mrf.mxu0 }
 0x4f7   :  { %v333_v58 = vadd.f32 %v566_v56, %v332_v57 }
 0x4f8   :  { %v621_v59 = vpop.f32.mrf.mxu0 }
 0x4f9   :  { %v338_v60 = vadd.f32 %v333_v58, %v841_v8 }
 0x4fa   :  { %v335_v61 = vpop.f32.mrf.mxu0 }
 0x4fb   :  { %v878_v62 = vmax.f32 %v338_v60, 0.0 }
 0x4fc   :  { %v622_v63 = vpop.f32.mrf.mxu0 }
 0x4fd   :  { %v340_v0 = vsel %vm111_vm1, %v878_v62, 0.0 }
 0x4fe   :  { %341 = vadd.xlane.f32.xlu0 %v340_v0 }
 0x587   :  { %v342_v2 = vpop.xlane.xlu0 %341 }
 0x588   :  { %v343_v3 = vmul.f32 0.03125, %v342_v2 }
 0x58a   :  { %v344_v4 = vsub.f32 %v878_v62, %v343_v3 }
 0x58c   :  { %v345_v5 = vmul.f32 %v344_v4, %v344_v4 }
 0x58e   :  { %v346_v6 = vsel %vm111_vm1, %v345_v5, 0.0 }
 0x58f   :  { %347 = vadd.xlane.f32.xlu1 %v346_v6 }
 0x618   :  { %v348_v8 = vpop.xlane.xlu1 %347 }
 0x619   :  { %v349_v10 = vmul.f32 0.03125, %v348_v8 }
 0x61b   :  { %v350_v11 = vadd.f32 1e-05, %v349_v10 }
 0x61d   :  { %661 = vrsqrt.f32 %v350_v11 }
 0x62a   :  { %v662_v12 = vpop.eup %661 }
 0x62b   :  { %v352_v14 = vmul.f32 %v662_v12, %v344_v4 }
 0x62d   :  { %v358_v16 = vmul.f32 %v570_v13, %v352_v14 }
 0x62f   :  { %v364_v17 = vadd.f32 %v571_v15, %v358_v16 }
 0x631   :  { %v365_v18 = vmax.f32 %v364_v17, 0.0 }
 0x633   :  { %v366_v19 = vpack.c.bf16 %v365_v18, %v365_v18 }
 0x635   :  { %628 = vmatmul.mubr.msk.bf16.vlgmr.msra.gmra.mxu1 %vm111_vm1, %v366_v19 }
 0x6f5   :  { %v426_v21 = vpop.f32.mrf.mxu1 }
 0x6f6   :  { %v427_v22 = vadd.f32 %v572_v20, %v426_v21 }
 0x6f7   :  { %v629_v23 = vpop.f32.mrf.mxu1 }
 0x6f8   :  { %v432_v24 = vsel %vm111_vm1, %v427_v22, 0.0 }
 0x6f9   :  { %433 = vadd.xlane.f32.xlu0 %v432_v24  ;;  %v429_v25 = vpop.f32.mrf.mxu1 }
 0x6fb   :  { %v630_v26 = vpop.f32.mrf.mxu1 }
 0x782   :  { %v434_v27 = vpop.xlane.xlu0 %433 }
 0x783   :  { %v435_v28 = vmul.f32 0.03125, %v434_v27 }
 0x785   :  { %v436_v29 = vsub.f32 %v427_v22, %v435_v28 }
 0x787   :  { %v437_v30 = vmul.f32 %v436_v29, %v436_v29 }
 0x789   :  { %v438_v31 = vsel %vm111_vm1, %v437_v30, 0.0 }
 0x78a   :  { %439 = vadd.xlane.f32.xlu1 %v438_v31 }
 0x813   :  { %v440_v34 = vpop.xlane.xlu1 %439 }
 0x814   :  { %v441_v35 = vmul.f32 0.03125, %v440_v34 }
 0x816   :  { %v442_v36 = vadd.f32 1e-05, %v441_v35 }
 0x818   :  { %663 = vrsqrt.f32 %v442_v36 }
 0x825   :  { %v664_v37 = vpop.eup %663 }
 0x826   :  { %v444_v39 = vmul.f32 %v664_v37, %v436_v29 }
 0x828   :  { %v450_v41 = vmul.f32 %v576_v38, %v444_v39 }
 0x82a   :  { %v456_v42 = vadd.f32 %v577_v40, %v450_v41 }
 0x82c   :  { %v457_v43 = vmax.f32 %v456_v42, 0.0 }
 0x82e   :  { %v458_v44 = vpack.c.bf16 %v457_v43, %v457_v43 }
 0x830   :  { %636 = vmatmul.mubr.msk.bf16.vlgmr.msra.gmra.mxu0 %vm111_vm1, %v458_v44 }
 0x8f0   :  { %v518_v45 = vpop.f32.mrf.mxu0 }
 0x8f1   :  { %v519_v46 = vadd.f32 %v578_v1, %v518_v45 }
 0x8f2   :  { %v637_v47 = vpop.f32.mrf.mxu0 }
 0x8f3   :  { %v524_v48 = vadd.f32 %v519_v46, %v878_v62 }
 0x8f4   :  { %v521_v49 = vpop.f32.mrf.mxu0 }
 0x8f5   :  { %v525_v51 = vmax.f32 %v524_v48, 0.0 }
 0x8f6   :  { %v638_v52 = vpop.f32.mrf.mxu0 }
 0x8f7   :  { %v533_v53 = vmul.f32 %v582_v50, %v525_v51 }
 0x8f9   :  { %v534_v54 = vsel %vm111_vm1, %v533_v53, 0.0 }
 0x8fa   :  { %535 = vadd.xlane.f32.xlu0 %v534_v54 }
 0x983   :  { %v536_v56 = vpop.xlane.xlu0 %535 }
 0x984   :  { %v544_v57 = vadd.f32 %v583_v55, %v536_v56 }
 0x986   :  { %546 = vst.msk [vmem:[%s925_s9] sm:$0xff] %vm545_vm2, %v544_v57 }
 0x987   :  { %551 = vsyncpa [#allocation4], 1 }
 0x988   :  { %552 = vsyncpa [#allocation6], 1 }
 0x989   :  { %553 = vsyncpa [#allocation9], 1 }

</bundles_post_ra>
